<compile_context>
chip_gen: v7x
topology: tpu7x:2x2x1
jax: 0.10.0
libtpu: 0.0.40
codegen_flags: <defaults>
</compile_context>

<pallas_src>
import jax
import jax.numpy as jnp
from jax.experimental import pallas as pl
from jax.experimental.pallas import tpu as pltpu


# Conservative budgets that work on v5e / v6e (128 MiB physical) and
# v7x (64 MiB physical, 32 MiB scoped default). Resident VMEM for this
# kernel ~= 2 buffers x (in + out) = 4 x tile_rows x F x itemsize.
_VMEM_RESIDENT_BUDGET = 24 * 1024 * 1024   # bytes of tile residency we allow
_VMEM_LIMIT_BYTES = 32 * 1024 * 1024       # raise v5e's 16 MiB scoped default


def _crelu_kernel(x_ref, o_ref):
    # Elementwise clamp on the whole VMEM tile (VPU min/max).
    x = x_ref[...]
    o_ref[...] = jnp.minimum(jnp.maximum(x, 0.0), 1.0).astype(o_ref.dtype)


def _pick_tile_rows(B, F, itemsize):
    """Largest row tile that keeps double-buffered in+out within budget."""
    max_rows = _VMEM_RESIDENT_BUDGET // (4 * F * itemsize)
    max_rows = max(8, (max_rows // 8) * 8)      # keep sublane-aligned
    tile = min(max_rows, 2048)                  # 2048 rows is well past the
                                                # ~85% roofline plateau and
                                                # leaves many grid steps for
                                                # v7x's two TensorCores.
    if B <= tile:
        return B                                # full-extent block is legal
    return tile


def crelu(x, *, tile_rows=None):
    """Clamped ReLU: clamp(x, 0, 1). Works on any-rank float input."""
    orig_shape = x.shape
    if x.ndim == 1:
        x2 = x.reshape(1, -1)
    elif x.ndim == 2:
        x2 = x
    else:
        # Flatten leading dims; keep the last (lane) dim dense.
        x2 = x.reshape(-1, orig_shape[-1])

    B, F = x2.shape
    if tile_rows is None:
        tile_rows = _pick_tile_rows(B, F, x2.dtype.itemsize)
    tile_rows = min(tile_rows, B)

    grid = (pl.cdiv(B, tile_rows),)

    out = pl.pallas_call(
        _crelu_kernel,
        out_shape=jax.ShapeDtypeStruct((B, F), x2.dtype),
        grid=grid,
        in_specs=[pl.BlockSpec((tile_rows, F), lambda i: (i, 0))],
        out_specs=pl.BlockSpec((tile_rows, F), lambda i: (i, 0)),
        compiler_params=pltpu.CompilerParams(
            dimension_semantics=("parallel",),
            vmem_limit_bytes=_VMEM_LIMIT_BYTES,
        ),
    )(x2)

    return out.reshape(orig_shape)


if __name__ == "__main__":
    key = jax.random.PRNGKey(0)
    # Small NNUE-ish hidden activation: batch=8, hidden=256.
    # (Real benchmarking should use >=1e5 rows; this is a correctness check.)
    x = jax.random.normal(key, (8, 256), dtype=jnp.float32) * 2.0

    out = crelu(x)
    out = jax.block_until_ready(out)

    # Correctness check against plain-JAX reference.
    ref = jnp.clip(x, 0.0, 1.0)
    assert out.shape == ref.shape and out.dtype == ref.dtype
    assert bool(jnp.allclose(out, ref)), "mismatch vs reference clamp"

    # Also exercise the tiled path (multiple grid steps + partial last block).
    x_big = jax.random.normal(jax.random.PRNGKey(1), (3000, 256), jnp.float32) * 3.0
    out_big = jax.block_until_ready(crelu(x_big, tile_rows=1024))
    assert bool(jnp.allclose(out_big, jnp.clip(x_big, 0.0, 1.0)))

    print("KERNEL_OK")
</pallas_src>

<mosaic_0001>
module attributes {stable_mosaic.version = 11 : i64} {
  func.func @_crelu_kernel(%arg0: i32, %arg1: memref<8x256xf32, #tpu.memory_space<vmem>>, %arg2: memref<8x256xf32, #tpu.memory_space<vmem>>) attributes {dimension_semantics = [#tpu.dimension_semantics<parallel>], iteration_bounds = array<i64: 1>, scalar_prefetch = 0 : i64, scratch_operands = 0 : i64, tpu.core_type = #tpu.core_type<tc>, window_params = [{transform_indices = @transform_0, window_bounds = array<i64: 8, 256>}, {transform_indices = @transform_1, window_bounds = array<i64: 8, 256>}]} {
    %c0 = arith.constant 0 : index
    %c0_0 = arith.constant 0 : index
    %0 = vector.load %arg1[%c0, %c0_0] : memref<8x256xf32, #tpu.memory_space<vmem>>, vector<8x256xf32>
    %cst = arith.constant 0.000000e+00 : f32
    %1 = vector.broadcast %cst : f32 to vector<8x256xf32>
    %2 = arith.maximumf %0, %1 : vector<8x256xf32>
    %cst_1 = arith.constant 1.000000e+00 : f32
    %3 = vector.broadcast %cst_1 : f32 to vector<8x256xf32>
    %4 = arith.minimumf %2, %3 : vector<8x256xf32>
    %c0_2 = arith.constant 0 : index
    %c0_3 = arith.constant 0 : index
    %5 = vector.load %arg2[%c0_2, %c0_3] : memref<8x256xf32, #tpu.memory_space<vmem>>, vector<8x256xf32>
    tpu.vector_store %arg2[%c0_2, %c0_3], %4 {strides = array<i32>} : memref<8x256xf32, #tpu.memory_space<vmem>>, vector<8x256xf32>,
    return
  }
  func.func @transform_0(%arg0: i32) -> (i32, i32) {
    %c0_i32 = arith.constant 0 : i32
    %c0_i32_0 = arith.constant 0 : i32
    return %arg0, %c0_i32 : i32, i32
  }
  func.func @transform_1(%arg0: i32) -> (i32, i32) {
    %c0_i32 = arith.constant 0 : i32
    %c0_i32_0 = arith.constant 0 : i32
    return %arg0, %c0_i32 : i32, i32
  }
}

</mosaic_0001>

<bundles_post_ra>
// kernel: tpu_custom_call.1
= control target key start
LH: loop header
LB: loop body
LE: loop exit
PB: predicated region body
PF: predicated region fallthrough
CT: control target
= control target key end

     0   :  { %6 = vsyncpa [#allocation3], 0  ;;  %s130_s0 = inlined_call_operand.hbm [shape: f32[8,256], index: 0, kind: input, shape index: {}]   ;;  %s131_s1 = inlined_call_operand.hbm [shape: f32[8,256], index: 1, kind: output, shape index: {}]  }
   0x1   :  { %7 = vsyncpa [#allocation4], 0  ;;  %s94_s6 = smov [#allocation2]   ;;  %s46_s10 = scalar_lea.hbm %s130_s0, 256 }
   0x2   :  { %s14_s7 = sshll.u32 %s94_s6, 4  ;;  %p47_p0 = scmp.ne.s32.totalorder %s130_s0, %s46_s10  ;;  %s15_s7 = int_to_ptr.vmem [resolvable:$true] %s14_s7 }
   0x3   :  { %p50_p1 = scmp.lt.u32.totalorder %s46_s10, %s130_s0 }
   0x5   :  { %p52_p2 = pnand %p50_p1, %p47_p0 }
   0x7   :  { %55 = shalt.err (!%p52_p2)
}
   0x8   :  { %s56_s15 = scalar_lea.vmem %s15_s7, 256  ;;  %p61_p4 = scmp.lt.s32.totalorder %s15_s7, %s15_s7 }
   0x9   :  { %p57_p3 = scmp.ne.s32.totalorder %s15_s7, %s56_s15  ;;  %p62_p5 = scmp.lt.s32.totalorder %s56_s15, %s56_s15 }
   0xb   :  { %p63_p6 = por %p62_p5, %p61_p4 }
   0xd   :  { %p64_p7 = pnand %p63_p6, %p57_p3 }
   0xf   :  { %67 = shalt.err (!%p64_p7)
}
  0x10   :  { %17 = dma.hbm_to_vmem [thread:$0]  %s130_s0, 256, %s15_s7, [#allocation3]  }
  0x11   :  { %90 = dma.done.wait [#allocation3], 256  }
  0x12   :  { %91 = vsyncadd [#allocation3], 4294967040  ;;  %v21_v0 = vld [vmem:[#allocation2] sm:$0xff]  ;;  %v22_v1 = vld [vmem:[#allocation2 + $0x8] sm:$0xff]  ;;  %s95_s18 = smov [#allocation5]  }
  0x13   :  { %s35_s19 = sshll.u32 %s95_s18, 4  ;;  %v23_v2 = vmax.f32 %v21_v0, 0.0  ;;  %v24_v3 = vmax.f32 %v22_v1, 0.0  ;;  %s36_s19 = int_to_ptr.vmem [resolvable:$true] %s35_s19 }
  0x14   :  { %s68_s20 = scalar_lea.vmem %s36_s19, 256  ;;  %p73_p9 = scmp.lt.s32.totalorder %s36_s19, %s36_s19 }
  0x15   :  { %v25_v4 = vmin.f32 %v23_v2, 1.0  ;;  %v26_v5 = vmin.f32 %v24_v3, 1.0  ;;  %p69_p8 = scmp.ne.s32.totalorder %s36_s19, %s68_s20  ;;  %p74_p10 = scmp.lt.s32.totalorder %s68_s20, %s68_s20 }
  0x17   :  { %27 = vst [vmem:[#allocation5] sm:$0xff] %v25_v4  ;;  %28 = vst [vmem:[#allocation5 + $0x8] sm:$0xff] %v26_v5  ;;  %p75_p11 = por %p74_p10, %p73_p9 }
  0x19   :  { %p76_p12 = pnand %p75_p11, %p69_p8 }
  0x1b   :  { %79 = shalt.err (!%p76_p12)
}
  0x1c   :  { %s80_s22 = scalar_lea.hbm %s131_s1, 256 }
  0x1d   :  { %p81_p13 = scmp.ne.s32.totalorder %s131_s1, %s80_s22  ;;  %p84_p0 = scmp.lt.u32.totalorder %s80_s22, %s131_s1 }
  0x1f   :  { %p86_p1 = pnand %p84_p0, %p81_p13 }
  0x21   :  { %89 = shalt.err (!%p86_p1)
}
  0x22   :  { %38 = dma.vmem_to_hbm [thread:$0]  %s36_s19, 256, %s131_s1, [#allocation4]  }
  0x23   :  { %92 = dma.done.wait [#allocation4], 256  }
  0x24   :  { %93 = vsyncadd [#allocation4], 4294967040 }
  0x25   :  { %42 = vsyncpa [#allocation3], 1 }
  0x26   :  { %43 = vsyncpa [#allocation4], 1 }

</bundles_post_ra>
